<compile_context>
chip_gen: v7x
topology: tpu7x:2x2x1
jax: 0.10.0
libtpu: 0.0.40
codegen_flags: <defaults>
</compile_context>

<pallas_src>
import functools

import jax
import jax.numpy as jnp
from jax.experimental import pallas as pl
from jax.experimental.pallas import tpu as pltpu


def _round_up(x, m):
    return ((x + m - 1) // m) * m


def _balanced_tile(dim, max_tile, align):
    """Largest aligned tile <= ~max_tile with minimal padding overshoot."""
    dim_a = _round_up(max(dim, 1), align)
    max_tile = max(_round_up(max_tile, align), align)
    if dim_a <= max_tile:
        return dim_a
    nblocks = -(-dim_a // max_tile)                 # ceil
    return _round_up(-(-dim_a // nblocks), align)   # <= max_tile by construction


# Generation-aware VMEM cap (v7x: 64 MiB physical; v5e/v6e: 128 MiB).
try:
    _VMEM_CAPACITY = int(pltpu.get_tpu_info().vmem_capacity_bytes)
except Exception:  # query can fail off-TPU / old jax -> v7x-safe fallback
    _VMEM_CAPACITY = 64 << 20
_VMEM_CAP = (_VMEM_CAPACITY * 3) // 4               # leave headroom for Mosaic


def _dense_ws_kernel(x_ref, w_ref, b_ref, o_ref):
    # Weight-stationary path: full K in a single block, bias + ReLU fused.
    # x_ref: (tm, Kp)  w_ref: (Kp, tn)  b_ref: (1, tn) f32  o_ref: (tm, tn)
    acc = jnp.dot(x_ref[...], w_ref[...], preferred_element_type=jnp.float32)
    acc += b_ref[...]
    o_ref[...] = jnp.maximum(acc, 0.0).astype(o_ref.dtype)


def _dense_kreduce_kernel(x_ref, w_ref, b_ref, o_ref, acc_ref):
    # K-reduction path: f32 VMEM accumulator resident across the K grid axis.
    # x_ref: (tm, tk)  w_ref: (tk, tn)  b_ref: (1, tn) f32  o/acc: (tm, tn)
    k = pl.program_id(2)

    @pl.when(k == 0)
    def _():
        # Fold the bias into the accumulator init; finalize is just ReLU+cast.
        acc_ref[...] = jnp.broadcast_to(b_ref[...], acc_ref.shape)

    acc_ref[...] += jnp.dot(
        x_ref[...], w_ref[...], preferred_element_type=jnp.float32
    )

    @pl.when(k == pl.num_programs(2) - 1)
    def _():
        o_ref[...] = jnp.maximum(acc_ref[...], 0.0).astype(o_ref.dtype)


@functools.partial(
    jax.jit,
    static_argnames=("tm", "tn", "tk", "compute_dtype", "allow_fast_path"),
)
def dense(x, w, b, *, tm=512, tn=512, tk=None,
          compute_dtype=jnp.bfloat16, allow_fast_path=True):
    """ReLU(x @ w + b).

    x: (..., K), w: (K, N), b: (N,).  Returns (..., N) in x.dtype.
    compute_dtype: dtype for the MXU operands (default bf16, f32 accumulation);
    None keeps the input dtype (exact f32 path).
    """
    orig_shape = x.shape
    K = orig_shape[-1]
    Kw, N = w.shape
    assert K == Kw, (K, Kw)

    out_dtype = x.dtype
    if compute_dtype is not None:
        x = x.astype(compute_dtype)
        w = w.astype(compute_dtype)

    x2 = x.reshape(-1, K)
    M = x2.shape[0]

    in_itemsize = jnp.dtype(x2.dtype).itemsize
    out_itemsize = jnp.dtype(out_dtype).itemsize
    align_m = 16 if in_itemsize == 2 else 8        # bf16 packs 16 rows per vreg

    tm_e = _balanced_tile(M, tm, align_m)
    tn_e = _balanced_tile(N, tn, 128)
    Mp = _round_up(M, tm_e)
    Np = _round_up(N, tn_e)

    # ---- weight-stationary fast path: full K resident, no K grid axis -------
    Kp_full = _round_up(K, 128)
    ws_bytes = (2 * tm_e * Kp_full * in_itemsize     # x tiles (double-buffered)
                + 2 * Kp_full * tn_e * in_itemsize   # w tiles (double-buffered)
                + 2 * tm_e * tn_e * out_itemsize     # out tiles
                + 2 * tn_e * 4)                      # bias tiles
    fast_budget = min(_VMEM_CAP, 32 << 20)           # conservative across gens
    use_ws = allow_fast_path and (ws_bytes + (2 << 20)) <= fast_budget

    if use_ws:
        Kp = Kp_full
    else:
        if tk is None:
            tk = 2048 if in_itemsize == 2 else 1024
        tk_e = _balanced_tile(K, tk, 128)
        Kp = _round_up(K, tk_e)

    # Pad only when needed (shapes are static under jit).
    # NOTE: for repeated calls with fixed weights, pre-pad w/b once outside.
    xp = x2 if (Mp == M and Kp == K) else jnp.pad(x2, ((0, Mp - M), (0, Kp - K)))
    wp = w if (Kp == K and Np == N) else jnp.pad(w, ((0, Kp - K), (0, Np - N)))
    bf = b.astype(jnp.float32)
    bp = (bf if Np == N else jnp.pad(bf, ((0, Np - N),))).reshape(1, Np)

    cost = pl.CostEstimate(
        flops=2 * Mp * Np * Kp,
        transcendentals=0,
        bytes_accessed=(Mp * Kp * in_itemsize + Kp * Np * in_itemsize
                        + Np * 4 + Mp * Np * out_itemsize),
    )

    if use_ws:
        grid = (Mp // tm_e, Np // tn_e)
        vmem_limit = min(max(ws_bytes + (4 << 20), 16 << 20), _VMEM_CAP)
        out_p = pl.pallas_call(
            _dense_ws_kernel,
            out_shape=jax.ShapeDtypeStruct((Mp, Np), out_dtype),
            grid_spec=pltpu.PrefetchScalarGridSpec(
                num_scalar_prefetch=0,
                grid=grid,
                in_specs=[
                    pl.BlockSpec((tm_e, Kp), lambda i, j: (i, 0)),   # x row-block
                    pl.BlockSpec((Kp, tn_e), lambda i, j: (0, j)),   # full-K w col-block
                    pl.BlockSpec((1, tn_e), lambda i, j: (0, j)),    # bias
                ],
                out_specs=pl.BlockSpec((tm_e, tn_e), lambda i, j: (i, j)),
            ),
            compiler_params=pltpu.CompilerParams(
                dimension_semantics=("parallel", "parallel"),
                vmem_limit_bytes=int(vmem_limit),
            ),
            cost_estimate=cost,
        )(xp, wp, bp)
    else:
        grid = (Mp // tm_e, Np // tn_e, Kp // tk_e)
        vmem_needed = (2 * tm_e * tk_e * in_itemsize
                       + 2 * tk_e * tn_e * in_itemsize
                       + 2 * tm_e * tn_e * out_itemsize
                       + 2 * tn_e * 4
                       + tm_e * tn_e * 4)             # f32 accumulator
        vmem_limit = min(max(vmem_needed + (4 << 20), 16 << 20), _VMEM_CAP)
        out_p = pl.pallas_call(
            _dense_kreduce_kernel,
            out_shape=jax.ShapeDtypeStruct((Mp, Np), out_dtype),
            grid_spec=pltpu.PrefetchScalarGridSpec(
                num_scalar_prefetch=0,
                grid=grid,
                in_specs=[
                    pl.BlockSpec((tm_e, tk_e), lambda i, j, k: (i, k)),  # x tile
                    pl.BlockSpec((tk_e, tn_e), lambda i, j, k: (k, j)),  # w tile
                    pl.BlockSpec((1, tn_e), lambda i, j, k: (0, j)),     # bias
                ],
                out_specs=pl.BlockSpec((tm_e, tn_e), lambda i, j, k: (i, j)),
                scratch_shapes=[pltpu.VMEM((tm_e, tn_e), jnp.float32)],
            ),
            compiler_params=pltpu.CompilerParams(
                dimension_semantics=("parallel", "parallel", "arbitrary"),
                vmem_limit_bytes=int(vmem_limit),
            ),
            cost_estimate=cost,
        )(xp, wp, bp)

    out = out_p[:M, :N]
    return out.reshape(*orig_shape[:-1], N)


if __name__ == "__main__":
    # Small shapes consistent with Dense(input_dim, output_dim, activation=ReLU)
    batch, input_dim, output_dim = 16, 32, 64

    key = jax.random.PRNGKey(0)
    kx, kw, kb = jax.random.split(key, 3)

    x = jax.random.normal(kx, (batch, input_dim), dtype=jnp.float32)
    # PyTorch nn.Linear init bounds; params stored as (in, out) / (out,).
    bound = 1.0 / (input_dim ** 0.5)
    w = jax.random.uniform(kw, (input_dim, output_dim), dtype=jnp.float32,
                           minval=-bound, maxval=bound)
    b = jax.random.uniform(kb, (output_dim,), dtype=jnp.float32,
                           minval=-bound, maxval=bound)

    ref = jnp.maximum(
        jnp.dot(x, w, precision=jax.lax.Precision.HIGHEST) + b, 0.0)

    # Default path: bf16 MXU compute, f32 accumulation, weight-stationary grid.
    out = jax.block_until_ready(dense(x, w, b))
    assert out.shape == (batch, output_dim), out.shape
    assert out.dtype == x.dtype, out.dtype
    assert jnp.allclose(out, ref, atol=3e-2, rtol=3e-2)

    # Exact f32 compute on the same fast path: tight tolerance.
    out_f32 = jax.block_until_ready(dense(x, w, b, compute_dtype=None))
    assert jnp.allclose(out_f32, ref, atol=1e-5, rtol=1e-5)

    # Exercise the K-reduction fallback path (multiple k steps, balanced tiles).
    M2, K2, N2 = 48, 256, 192
    x2 = jax.random.normal(kx, (M2, K2), dtype=jnp.float32)
    w2 = jax.random.uniform(kw, (K2, N2), dtype=jnp.float32,
                            minval=-0.06, maxval=0.06)
    b2 = jax.random.uniform(kb, (N2,), dtype=jnp.float32,
                            minval=-0.06, maxval=0.06)
    ref2 = jnp.maximum(
        jnp.dot(x2, w2, precision=jax.lax.Precision.HIGHEST) + b2, 0.0)
    out2 = jax.block_until_ready(
        dense(x2, w2, b2, tk=128, compute_dtype=None, allow_fast_path=False))
    assert jnp.allclose(out2, ref2, atol=1e-4, rtol=1e-4)

    print("KERNEL_OK")
</pallas_src>

<mosaic_0001>
module attributes {stable_mosaic.version = 11 : i64} {
  func.func @_dense_ws_kernel(%arg0: i32, %arg1: i32, %arg2: memref<16x128xbf16, #tpu.memory_space<vmem>>, %arg3: memref<128x128xbf16, #tpu.memory_space<vmem>>, %arg4: memref<1x128xf32, #tpu.memory_space<vmem>>, %arg5: memref<16x128xf32, #tpu.memory_space<vmem>>) attributes {dimension_semantics = [#tpu.dimension_semantics<parallel>, #tpu.dimension_semantics<parallel>], iteration_bounds = array<i64: 1, 1>, scalar_prefetch = 0 : i64, scratch_operands = 0 : i64, tpu.core_type = #tpu.core_type<tc>, window_params = [{transform_indices = @transform_0, window_bounds = array<i64: 16, 128>}, {transform_indices = @transform_1, window_bounds = array<i64: 128, 128>}, {transform_indices = @transform_2, window_bounds = array<i64: 1, 128>}, {transform_indices = @transform_3, window_bounds = array<i64: 16, 128>}]} {
    %c0 = arith.constant 0 : index
    %c0_0 = arith.constant 0 : index
    %0 = vector.load %arg2[%c0, %c0_0] : memref<16x128xbf16, #tpu.memory_space<vmem>>, vector<16x128xbf16>
    %c0_1 = arith.constant 0 : index
    %c0_2 = arith.constant 0 : index
    %1 = vector.load %arg3[%c0_1, %c0_2] : memref<128x128xbf16, #tpu.memory_space<vmem>>, vector<128x128xbf16>
    %cst = arith.constant dense<0.000000e+00> : vector<16x128xf32>
    %2 = tpu.matmul %0, %1, %cst {dimension_numbers = #tpu.dot_dimension_numbers<[1], [0], [0], [1], [0, 0, 1, 1], [], []>} : vector<16x128xbf16>, vector<128x128xbf16>, vector<16x128xf32> -> vector<16x128xf32>
    %c0_3 = arith.constant 0 : index
    %c0_4 = arith.constant 0 : index
    %3 = vector.load %arg4[%c0_3, %c0_4] : memref<1x128xf32, #tpu.memory_space<vmem>>, vector<1x128xf32>
    %4 = vector.broadcast %3 : vector<1x128xf32> to vector<16x128xf32>
    %5 = arith.addf %2, %4 : vector<16x128xf32>
    %cst_5 = arith.constant 0.000000e+00 : f32
    %6 = vector.broadcast %cst_5 : f32 to vector<16x128xf32>
    %7 = arith.maximumf %5, %6 : vector<16x128xf32>
    %c0_6 = arith.constant 0 : index
    %c0_7 = arith.constant 0 : index
    %8 = vector.load %arg5[%c0_6, %c0_7] : memref<16x128xf32, #tpu.memory_space<vmem>>, vector<16x128xf32>
    tpu.vector_store %arg5[%c0_6, %c0_7], %7 {strides = array<i32>} : memref<16x128xf32, #tpu.memory_space<vmem>>, vector<16x128xf32>,
    return
  }
  func.func @transform_0(%arg0: i32, %arg1: i32) -> (i32, i32) {
    %c0_i32 = arith.constant 0 : i32
    %c0_i32_0 = arith.constant 0 : i32
    return %arg0, %c0_i32 : i32, i32
  }
  func.func @transform_1(%arg0: i32, %arg1: i32) -> (i32, i32) {
    %c0_i32 = arith.constant 0 : i32
    %c0_i32_0 = arith.constant 0 : i32
    return %c0_i32, %arg1 : i32, i32
  }
  func.func @transform_2(%arg0: i32, %arg1: i32) -> (i32, i32) {
    %c0_i32 = arith.constant 0 : i32
    %c0_i32_0 = arith.constant 0 : i32
    return %c0_i32, %arg1 : i32, i32
  }
  func.func @transform_3(%arg0: i32, %arg1: i32) -> (i32, i32) {
    %c0_i32 = arith.constant 0 : i32
    return %arg0, %arg1 : i32, i32
  }
}

</mosaic_0001>

<bundles_post_ra>
// kernel: dense.1
= control target key start
LH: loop header
LB: loop body
LE: loop exit
PB: predicated region body
PF: predicated region fallthrough
CT: control target
= control target key end

     0   :  { %v233_v1 = vmov 0.0   ;;  %vm234_vm0 = vmmov 0   ;;  %s300_s0 = inlined_call_operand.vmem [shape: bf16[16,128], index: 0, kind: input, shape index: {}]   ;;  %s301_s1 = inlined_call_operand.vmem [shape: bf16[128,128], index: 1, kind: input, shape index: {}]   ;;  %s302_s2 = inlined_call_operand.vmem [shape: f32[1,128], index: 2, kind: input, shape index: {}]   ;;  %s303_s3 = inlined_call_operand.hbm [shape: f32[16,128], index: 3, kind: output, shape index: {}]  }
   0x1   :  { %v200_v0 = vld [vmem:[%s301_s1] sm:$0xff]   ;;  %175 = vmatprep.subr.bf16.mxu0 %v233_v1  ;;  %v201_v2 = vld [vmem:[%s301_s1 + $0x8] sm:$0xff]   ;;  %191 = vmatprep.mubr.msk.bf16.mxu0 %vm234_vm0, %v233_v1  ;;  %v202_v3 = vld [vmem:[%s301_s1 + $0x10] sm:$0xff]  }
   0x2   :  { %176 = vmatpush3.bf16.msra.mxu0 %v200_v0 }
   0x3   :  { %177 = vmatprep.subr.bf16.mxu0 %v233_v1 }
   0x6   :  { %178 = vmatpush3.bf16.msra.mxu0 %v201_v2 }
   0x7   :  { %179 = vmatprep.subr.bf16.mxu0 %v233_v1 }
   0x8   :  { %8 = vsyncpa [#allocation3], 0  ;;  %v203_v4 = vld [vmem:[%s301_s1 + $0x18] sm:$0xff]   ;;  %v204_v5 = vld [vmem:[%s301_s1 + $0x20] sm:$0xff]   ;;  %s235_s5 = smov [#allocation2]  }
   0x9   :  { %v205_v6 = vld [vmem:[%s301_s1 + $0x28] sm:$0xff]   ;;  %v206_v7 = vld [vmem:[%s301_s1 + $0x30] sm:$0xff]   ;;  %v207_v8 = vld [vmem:[%s301_s1 + $0x38] sm:$0xff]   ;;  %s145_s6 = sshll.u32 %s235_s5, 4  ;;  %s146_s6 = int_to_ptr.vmem [resolvable:$true] %s145_s6 }
   0xa   :  { %180 = vmatpush3.bf16.msra.mxu0 %v202_v3  ;;  %v208_v9 = vld [vmem:[%s300_s0] sm:$0xff]   ;;  %s209_s0 = scalar_lea.vmem %s146_s6, 256  ;;  %p214_p1 = scmp.lt.s32.totalorder %s146_s6, %s146_s6 }
   0xb   :  { %181 = vmatprep.subr.bf16.mxu0 %v233_v1  ;;  %v156_v10 = vld [vmem:[%s302_s2] ss:$0 sm:$0xff]  ;;  %p210_p0 = scmp.ne.s32.totalorder %s146_s6, %s209_s0  ;;  %p215_p2 = scmp.lt.s32.totalorder %s209_s0, %s209_s0 }
   0xd   :  { %p216_p3 = por %p215_p2, %p214_p1 }
   0xe   :  { %182 = vmatpush3.bf16.msra.mxu0 %v203_v4 }
   0xf   :  { %183 = vmatprep.subr.bf16.mxu0 %v233_v1  ;;  %p217_p4 = pnand %p216_p3, %p210_p0 }
  0x12   :  { %184 = vmatpush3.bf16.msra.mxu0 %v204_v5 }
  0x13   :  { %185 = vmatprep.subr.bf16.mxu0 %v233_v1 }
  0x16   :  { %186 = vmatpush3.bf16.msra.mxu0 %v205_v6 }
  0x17   :  { %187 = vmatprep.subr.bf16.mxu0 %v233_v1 }
  0x1a   :  { %188 = vmatpush3.bf16.msra.mxu0 %v206_v7 }
  0x1b   :  { %189 = vmatprep.subr.bf16.mxu0 %v233_v1 }
  0x1e   :  { %190 = vmatpush3.bf16.msra.mxu0 %v207_v8 }
  0x21   :  { %192 = vmatmul.mubr.bf16.vlgmr.msra.gmra.mrb[0].mxu0 %v208_v9 }
  0xf4   :  { %v129_v11 = vpop.f32.mrb[0].mxu0 }
  0xf5   :  { %v130_v12 = vadd.f32 %v156_v10, %v129_v11  ;;  %v193_v13 = vpop.f32.mrb[1].mxu0 }
  0xf6   :  { %v132_v14 = vpop.f32.mrb[2].mxu0 }
  0xf7   :  { %v136_v15 = vmax.f32 %v130_v12, 0.0  ;;  %v133_v16 = vadd.f32 %v156_v10, %v132_v14  ;;  %v194_v17 = vpop.f32.mrb[3].mxu0 }
  0xf9   :  { %138 = vst [vmem:[#allocation2] sm:$0xff] %v136_v15  ;;  %v137_v18 = vmax.f32 %v133_v16, 0.0 }
  0xfb   :  { %139 = vst [vmem:[#allocation2 + $0x8] sm:$0xff] %v137_v18 }
  0xfc   :  { %220 = shalt.err (!%p217_p4)
}
  0xfd   :  { %s221_s7 = scalar_lea.hbm %s303_s3, 256 }
  0xfe   :  { %p222_p5 = scmp.ne.s32.totalorder %s303_s3, %s221_s7  ;;  %p225_p6 = scmp.lt.u32.totalorder %s221_s7, %s303_s3 }
 0x100   :  { %p227_p7 = pnand %p225_p6, %p222_p5 }
 0x102   :  { %230 = shalt.err (!%p227_p7)
}
 0x103   :  { %s236_s12 = smov 128   ;;  %s237_s13 = smov 8  }
 0x104   :  { %151 = dma.vmem_to_hbm [thread:$0]  %s146_s6, 256, %s303_s3, [#allocation3], %s236_s12, %s236_s12, %s237_s13  }
 0x105   :  { %231 = dma.done.wait [#allocation3], 256  }
 0x106   :  { %232 = vsyncadd [#allocation3], 4294967040 }
 0x107   :  { %155 = vsyncpa [#allocation3], 1 }

</bundles_post_ra>
